<compile_context>
chip_gen: v7x
topology: tpu7x:2x2x1
jax: 0.10.0
libtpu: 0.0.40
codegen_flags: <defaults>
</compile_context>

<pallas_src>
from functools import partial

import jax
import jax.numpy as jnp
from jax import lax
from jax.experimental import pallas as pl
from jax.experimental.pallas import tpu as pltpu


def _rmsnorm_kernel(x_ref, w_ref, o_ref, *, eps, reuse_f32):
    # x_ref: (TILE_ROWS, H) input dtype; w_ref: (1, H); o_ref: (TILE_ROWS, H).
    x_f32 = x_ref[...].astype(jnp.float32)
    var = jnp.mean(x_f32 * x_f32, axis=-1, keepdims=True)
    inv = lax.rsqrt(var + eps)  # EUP slot; essentially free in a mem-bound kernel
    if reuse_f32:
        # v5e/v6e (128 MiB VMEM): keep the f32 tile live, avoid the second
        # cast pass (VALU margin is thinner there, VMEM is plentiful).
        scaled = x_f32 * inv
    else:
        # v7x (64 MiB VMEM): re-read + re-cast so no full f32 tile stays live
        # across both the reduction and the scale -> bigger row tiles.
        scaled = x_ref[...].astype(jnp.float32) * inv
    # Cast back to input dtype first, then multiply by weight (PyTorch order).
    o_ref[...] = (w_ref[...] * scaled.astype(x_ref.dtype)).astype(o_ref.dtype)


def _align_up(n, m):
    return ((n + m - 1) // m) * m


def _vmem_per_core_bytes():
    """Per-TensorCore VMEM capacity, clamped conservatively."""
    kind = ""
    try:
        kind = jax.devices()[0].device_kind.lower()
    except Exception:
        pass
    if "7" in kind:
        # v7x: 64 MiB per TensorCore; a chip-level query may report 2x that.
        return 64 * 1024 * 1024
    try:
        cap = int(pltpu.get_tpu_info().vmem_capacity_bytes)
        if cap > 0:
            return min(cap, 128 * 1024 * 1024)
    except Exception:
        pass
    if ("v5" in kind) or ("v6" in kind):
        return 128 * 1024 * 1024
    return 64 * 1024 * 1024  # conservative fallback


def _choose_tiling(rows, hidden, in_dtype, out_dtype):
    """Pick (tile_rows, grid_len, vmem_limit_bytes, reuse_f32)."""
    in_bytes = jnp.dtype(in_dtype).itemsize
    out_bytes = jnp.dtype(out_dtype).itemsize
    # Sublane packing of the input dtype: f32 -> 8, bf16 -> 16, int8/fp8 -> 32.
    sublane = {1: 32, 2: 16, 4: 8}.get(in_bytes, 8)

    cap = _vmem_per_core_bytes()
    # Headroom below physical VMEM plus a few MiB for Mosaic internal scratch.
    vmem_limit = min(int(cap * 0.85), cap - 8 * 1024 * 1024)
    # Single-pass (reuse f32) on 128 MiB parts; two-pass re-read on 64 MiB parts.
    reuse_f32 = cap >= 96 * 1024 * 1024

    tile_budget = int(vmem_limit * 0.7)  # share of the limit for tile buffers
    # Per-row VMEM of one pipeline step: double-buffered input + output, plus
    # the f32 temporary (one transient tile when re-reading, ~two when kept).
    f32_tmp = 8 if reuse_f32 else 4
    bytes_per_row = hidden * (2 * in_bytes + 2 * out_bytes + f32_tmp)
    max_by_vmem = max(sublane, tile_budget // bytes_per_row)

    # ~2 steps per TensorCore (4 total) keeps the DMA pipeline full and lets
    # the row axis split across v7x's 2 cores without over-shrinking tiles.
    min_steps = 4
    max_by_grid = max(sublane, pl.cdiv(rows, min_steps))

    tile_rows = int(min(2048, max_by_vmem, max_by_grid))
    tile_rows = max(sublane, (tile_rows // sublane) * sublane)

    grid_len = pl.cdiv(rows, tile_rows)
    # Prefer a grid that is >= 2 and even so it splits evenly across 2 TCs
    # (harmless on 1-TC chips: at most one extra pipelined step).
    if grid_len == 1 and rows > sublane:
        tile_rows = max(sublane, _align_up(pl.cdiv(rows, 2), sublane))
        grid_len = pl.cdiv(rows, tile_rows)
    elif grid_len > 1 and grid_len % 2 == 1:
        cand = max(sublane, _align_up(pl.cdiv(rows, grid_len + 1), sublane))
        if pl.cdiv(rows, cand) % 2 == 0:
            tile_rows, grid_len = cand, pl.cdiv(rows, cand)

    return tile_rows, grid_len, vmem_limit, reuse_f32


def llama_rmsnorm(x, weight, eps=1e-6):
    """x: (..., hidden), weight: (hidden,). Returns same shape, promoted dtype."""
    orig_shape = x.shape
    hidden = orig_shape[-1]
    x2d = x.reshape(-1, hidden)
    rows = x2d.shape[0]

    out_dtype = jnp.promote_types(weight.dtype, x.dtype)
    in_bytes = jnp.dtype(x.dtype).itemsize
    out_bytes = jnp.dtype(out_dtype).itemsize

    tile_rows, grid_len, vmem_limit, reuse_f32 = _choose_tiling(
        rows, hidden, x.dtype, out_dtype
    )

    w2d = weight.reshape(1, hidden)

    # Advisory cost: rows actually covered by the launched grid (partial last
    # block included), weight DMA counted once.
    covered_rows = grid_len * tile_rows
    cost = pl.CostEstimate(
        flops=3 * covered_rows * hidden,
        transcendentals=covered_rows,
        bytes_accessed=covered_rows * hidden * (in_bytes + out_bytes)
        + hidden * jnp.dtype(weight.dtype).itemsize,
    )

    out = pl.pallas_call(
        partial(_rmsnorm_kernel, eps=eps, reuse_f32=reuse_f32),
        out_shape=jax.ShapeDtypeStruct((rows, hidden), out_dtype),
        grid_spec=pltpu.PrefetchScalarGridSpec(
            num_scalar_prefetch=0,
            grid=(grid_len,),
            in_specs=[
                # Partial last block: garbage rows stay confined (per-row
                # reduction) and their out-of-bounds stores are dropped.
                pl.BlockSpec((tile_rows, hidden), lambda i: (i, 0)),
                pl.BlockSpec((1, hidden), lambda i: (0, 0)),  # weight resident
            ],
            out_specs=pl.BlockSpec((tile_rows, hidden), lambda i: (i, 0)),
        ),
        compiler_params=pltpu.CompilerParams(
            dimension_semantics=("parallel",),
            vmem_limit_bytes=vmem_limit,
        ),
        cost_estimate=cost,
    )(x2d, w2d)

    return out.reshape(orig_shape[:-1] + (hidden,))


def _reference(x, weight, eps=1e-6):
    input_dtype = x.dtype
    x_f32 = x.astype(jnp.float32)
    var = jnp.mean(x_f32 * x_f32, axis=-1, keepdims=True)
    x_norm = x_f32 * lax.rsqrt(var + eps)
    return weight * x_norm.astype(input_dtype)


if __name__ == "__main__":
    key = jax.random.PRNGKey(0)
    batch, seq, hidden = 2, 8, 128

    x = jax.random.normal(key, (batch, seq, hidden), dtype=jnp.float32).astype(
        jnp.bfloat16
    )
    # Parameter initialized deterministically as in the module's __init__ (ones).
    weight = jnp.ones((hidden,), dtype=jnp.bfloat16)

    out = jax.block_until_ready(llama_rmsnorm(x, weight, eps=1e-6))
    ref = _reference(x, weight, eps=1e-6)
    assert out.shape == x.shape
    assert out.dtype == jnp.bfloat16
    assert jnp.allclose(
        out.astype(jnp.float32), ref.astype(jnp.float32), atol=1e-2, rtol=1e-2
    ), "mismatch vs reference"

    # Ragged row count (3*5 = 15 rows) exercises the partial last block
    # (no host-side pad/slice copies anymore).
    x2 = jax.random.normal(
        jax.random.PRNGKey(1), (3, 5, hidden), dtype=jnp.float32
    ).astype(jnp.bfloat16)
    out2 = jax.block_until_ready(llama_rmsnorm(x2, weight, eps=1e-6))
    ref2 = _reference(x2, weight, eps=1e-6)
    assert out2.shape == x2.shape
    assert jnp.allclose(
        out2.astype(jnp.float32), ref2.astype(jnp.float32), atol=1e-2, rtol=1e-2
    ), "mismatch vs reference (ragged rows)"

    print("KERNEL_OK")
</pallas_src>

<mosaic_0001>
module attributes {stable_mosaic.version = 11 : i64} {
  func.func @_rmsnorm_kernel(%arg0: i32, %arg1: memref<16x128xbf16, #tpu.memory_space<vmem>>, %arg2: memref<1x128xbf16, #tpu.memory_space<vmem>>, %arg3: memref<16x128xbf16, #tpu.memory_space<vmem>>) attributes {dimension_semantics = [#tpu.dimension_semantics<parallel>], iteration_bounds = array<i64: 1>, scalar_prefetch = 0 : i64, scratch_operands = 0 : i64, tpu.core_type = #tpu.core_type<tc>, window_params = [{transform_indices = @transform_0, window_bounds = array<i64: 16, 128>}, {pipeline_mode = #tpu.pipeline_mode<synchronous>, transform_indices = @transform_1, window_bounds = array<i64: 1, 128>}, {transform_indices = @transform_2, window_bounds = array<i64: 16, 128>}]} {
    %c0 = arith.constant 0 : index
    %c0_0 = arith.constant 0 : index
    %0 = vector.load %arg1[%c0, %c0_0] : memref<16x128xbf16, #tpu.memory_space<vmem>>, vector<16x128xbf16>
    %1 = arith.extf %0 : vector<16x128xbf16> to vector<16x128xf32>
    %2 = arith.mulf %1, %1 : vector<16x128xf32>
    %cst = arith.constant dense<0.000000e+00> : vector<16xf32>
    %3 = vector.multi_reduction <add>, %2, %cst [1] : vector<16x128xf32> to vector<16xf32>
    %4 = vector.shape_cast %3 : vector<16xf32> to vector<16x1xf32>
    %cst_1 = arith.constant 1.280000e+02 : f32
    %5 = vector.broadcast %cst_1 : f32 to vector<16x1xf32>
    %6 = arith.divf %4, %5 : vector<16x1xf32>
    %cst_2 = arith.constant 9.99999997E-7 : f32
    %7 = vector.broadcast %cst_2 : f32 to vector<16x1xf32>
    %8 = arith.addf %6, %7 : vector<16x1xf32>
    %9 = math.rsqrt %8 : vector<16x1xf32>
    %c0_3 = arith.constant 0 : index
    %c0_4 = arith.constant 0 : index
    %10 = vector.load %arg1[%c0_3, %c0_4] : memref<16x128xbf16, #tpu.memory_space<vmem>>, vector<16x128xbf16>
    %11 = arith.extf %10 : vector<16x128xbf16> to vector<16x128xf32>
    %12 = vector.broadcast %9 : vector<16x1xf32> to vector<16x128xf32>
    %13 = arith.mulf %11, %12 : vector<16x128xf32>
    %c0_5 = arith.constant 0 : index
    %c0_6 = arith.constant 0 : index
    %14 = vector.load %arg2[%c0_5, %c0_6] : memref<1x128xbf16, #tpu.memory_space<vmem>>, vector<1x128xbf16>
    %15 = arith.truncf %13 : vector<16x128xf32> to vector<16x128xbf16>
    %16 = vector.broadcast %14 : vector<1x128xbf16> to vector<16x128xbf16>
    %17 = arith.mulf %16, %15 : vector<16x128xbf16>
    %c0_7 = arith.constant 0 : index
    %c0_8 = arith.constant 0 : index
    %18 = vector.load %arg3[%c0_7, %c0_8] : memref<16x128xbf16, #tpu.memory_space<vmem>>, vector<16x128xbf16>
    tpu.vector_store %arg3[%c0_7, %c0_8], %17 {strides = array<i32>} : memref<16x128xbf16, #tpu.memory_space<vmem>>, vector<16x128xbf16>,
    return
  }
  func.func @transform_0(%arg0: i32) -> (i32, i32) {
    %c0_i32 = arith.constant 0 : i32
    %c0_i32_0 = arith.constant 0 : i32
    return %arg0, %c0_i32 : i32, i32
  }
  func.func @transform_1(%arg0: i32) -> (i32, i32) {
    %c0_i32 = arith.constant 0 : i32
    %c0_i32_0 = arith.constant 0 : i32
    %c0_i32_1 = arith.constant 0 : i32
    return %c0_i32, %c0_i32_0 : i32, i32
  }
  func.func @transform_2(%arg0: i32) -> (i32, i32) {
    %c0_i32 = arith.constant 0 : i32
    %c0_i32_0 = arith.constant 0 : i32
    return %arg0, %c0_i32 : i32, i32
  }
}

</mosaic_0001>

<bundles_post_ra>
// kernel: tpu_custom_call.1
= control target key start
LH: loop header
LB: loop body
LE: loop exit
PB: predicated region body
PF: predicated region fallthrough
CT: control target
= control target key end

     0   :  { %7 = vsyncpa [#allocation3], 0  ;;  %s195_s0 = inlined_call_operand.hbm [shape: bf16[16,128], index: 0, kind: input, shape index: {}]   ;;  %s196_s1 = inlined_call_operand.vmem [shape: bf16[1,128], index: 1, kind: input, shape index: {}]   ;;  %s197_s2 = inlined_call_operand.hbm [shape: bf16[16,128], index: 2, kind: output, shape index: {}]  }
   0x1   :  { %8 = vsyncpa [#allocation4], 0  ;;  %s143_s9 = smov [#allocation2]   ;;  %s95_s13 = scalar_lea.hbm %s195_s0, 128 }
   0x2   :  { %s14_s10 = sshll.u32 %s143_s9, 4  ;;  %p96_p0 = scmp.ne.s32.totalorder %s195_s0, %s95_s13  ;;  %s15_s10 = int_to_ptr.vmem [resolvable:$true] %s14_s10 }
   0x3   :  { %p99_p1 = scmp.lt.u32.totalorder %s95_s13, %s195_s0 }
   0x5   :  { %p101_p2 = pnand %p99_p1, %p96_p0 }
   0x7   :  { %104 = shalt.err (!%p101_p2)
}
   0x8   :  { %s105_s18 = scalar_lea.vmem %s15_s10, 128  ;;  %p110_p4 = scmp.lt.s32.totalorder %s15_s10, %s15_s10 }
   0x9   :  { %p106_p3 = scmp.ne.s32.totalorder %s15_s10, %s105_s18  ;;  %p111_p5 = scmp.lt.s32.totalorder %s105_s18, %s105_s18 }
   0xb   :  { %p112_p6 = por %p111_p5, %p110_p4 }
   0xd   :  { %p113_p7 = pnand %p112_p6, %p106_p3 }
   0xf   :  { %116 = shalt.err (!%p113_p7)
}
  0x10   :  { %s144_s19 = smov 64   ;;  %s145_s20 = smov 4  }
  0x11   :  { %20 = dma.hbm_to_vmem [thread:$0]  %s195_s0, 128, %s15_s10, [#allocation3], %s144_s19, %s144_s19, %s145_s20  }
  0x12   :  { %139 = dma.done.wait [#allocation3], 128  }
  0x13   :  { %140 = vsyncadd [#allocation3], 4294967168  ;;  %v84_v0 = vld [vmem:[#allocation2] sm:$0xff]   ;;  %v50_v11 = vlaneseq  ;;  %s146_s24 = smov [#allocation5]  }
  0x14   :  { %v85_v1 = vunpack.c.l.bf16 %v84_v0  ;;  %v86_v2 = vunpack.c.h.bf16 %v84_v0  ;;  %v45_v13 = vld [vmem:[%s196_s1] sm:$0x1]  ;;  %s69_s25 = sshll.u32 %s146_s24, 4  ;;  %s70_s25 = int_to_ptr.vmem [resolvable:$true] %s69_s25 }
  0x15   :  { %v51_v12 = vshrl.u32 %v50_v11, 7  ;;  %v48_v14 = vpack.i.b16 %v45_v13, %v45_v13  ;;  %s117_s26 = scalar_lea.vmem %s70_s25, 128  ;;  %p122_p9 = scmp.lt.s32.totalorder %s70_s25, %s70_s25 }
  0x16   :  { %v30_v3 = vmul.f32 %v85_v1, %v85_v1  ;;  %v31_v4 = vmul.f32 %v86_v2, %v86_v2  ;;  %p118_p8 = scmp.ne.s32.totalorder %s70_s25, %s117_s26  ;;  %p123_p10 = scmp.lt.s32.totalorder %s117_s26, %s117_s26 }
  0x17   :  { %v52_v15 = vsub.s32 0, %v51_v12 }
  0x18   :  { %32 = vadd.xlane.f32.xlu0 %v30_v3  ;;  %p124_p11 = por %p123_p10, %p122_p9 }
  0x19   :  { %v53_v20 = vrot.slane %v48_v14, %v52_v15 }
  0x1a   :  { %p125_p12 = pnand %p124_p11, %p118_p8 }
  0x1c   :  { %34 = vadd.xlane.f32.xlu0 %v31_v4 }
  0xa5   :  { %v33_v5 = vpop.xlane.xlu0 %32 }
  0xa6   :  { %v37_v6 = vmul.f32 0.0078125, %v33_v5 }
  0xa8   :  { %v39_v7 = vadd.f32 1e-06, %v37_v6 }
  0xa9   :  { %v35_v8 = vpop.xlane.xlu0 %34 }
  0xaa   :  { %v38_v9 = vmul.f32 0.0078125, %v35_v8  ;;  %91 = vrsqrt.f32 %v39_v7 }
  0xac   :  { %v40_v10 = vadd.f32 1e-06, %v38_v9 }
  0xae   :  { %93 = vrsqrt.f32 %v40_v10 }
  0xb4   :  { %v92_v16 = vpop.eup %91 }
  0xb5   :  { %v43_v18 = vmul.f32 %v92_v16, %v85_v1 }
  0xb8   :  { %v94_v17 = vpop.eup %93 }
  0xb9   :  { %v44_v19 = vmul.f32 %v94_v17, %v86_v2 }
  0xbb   :  { %v46_v21 = vpack.c.bf16 %v44_v19, %v43_v18 }
  0xbd   :  { %v54_v22 = vmul.bf16 %v53_v20, %v46_v21 }
  0xbf   :  { %v81_v23 = vcombine.low %v54_v22, %v54_v22  ;;  %v82_v24 = vcombine.high %v54_v22, %v54_v22 }
  0xc1   :  { %62 = vst [vmem:[#allocation5] sm:$0xf] %v81_v23  ;;  %63 = vst [vmem:[#allocation5 + $0x4] sm:$0xf] %v82_v24 }
  0xc2   :  { %128 = shalt.err (!%p125_p12)
}
  0xc3   :  { %s129_s28 = scalar_lea.hbm %s197_s2, 128 }
  0xc4   :  { %p130_p13 = scmp.ne.s32.totalorder %s197_s2, %s129_s28  ;;  %p133_p0 = scmp.lt.u32.totalorder %s129_s28, %s197_s2 }
  0xc6   :  { %p135_p1 = pnand %p133_p0, %p130_p13 }
  0xc8   :  { %138 = shalt.err (!%p135_p1)
}
  0xc9   :  { %75 = dma.vmem_to_hbm [thread:$0]  %s70_s25, 128, %s197_s2, [#allocation4], %s144_s19, %s144_s19, %s145_s20  }
  0xca   :  { %141 = dma.done.wait [#allocation4], 128  }
  0xcb   :  { %142 = vsyncadd [#allocation4], 4294967168 }
  0xcc   :  { %79 = vsyncpa [#allocation3], 1 }
  0xcd   :  { %80 = vsyncpa [#allocation4], 1 }

</bundles_post_ra>
